<compile_context>
chip_gen: v5e
topology: v5e:2x2
jax: 0.10.0
libtpu: 0.0.40
codegen_flags: <defaults>
</compile_context>

<pallas_src>
import math

import jax
import jax.numpy as jnp
from jax.experimental import pallas as pl
from jax.experimental.pallas import tpu as pltpu


_MAX_DMA_CHUNKS = 8                 # few in-flight descriptors; per-desc cost stays negligible
_DEFAULT_MIN_PALLAS_BYTES = 256 * 1024  # below this, XLA slice wins (fusable, no launch cost)


def _make_get_first_kernel(chunk_bounds):
    """Build a kernel that copies x[0] -> out via len(chunk_bounds) parallel DMAs.

    chunk_bounds: static tuple of (row_start, row_size) covering out.shape[0].
    """

    def kernel(x_hbm, o_hbm, sems):
        copies = []
        # Start every chunk copy first (multiple in-flight DMA descriptors) ...
        for idx, (start, size) in enumerate(chunk_bounds):
            cp = pltpu.make_async_copy(
                x_hbm.at[0, pl.ds(start, size)],
                o_hbm.at[pl.ds(start, size)],
                sems.at[idx],
            )
            cp.start()
            copies.append(cp)
        # ... then wait on all of them.
        for cp in copies:
            cp.wait()

    return kernel


def get_first(x: jax.Array, *, min_pallas_bytes: int = _DEFAULT_MIN_PALLAS_BYTES) -> jax.Array:
    """Pallas implementation of GetFirst.forward: returns x[0]."""
    if x.ndim < 3:
        # 0-D / 1-D result: no useful DMA form (and review flagged 1-D HBM->HBM
        # copies as layout-fragile) — plain slicing is the right tool.
        return x[0]

    out_shape = x.shape[1:]
    out_bytes = math.prod(out_shape) * jnp.dtype(x.dtype).itemsize
    if out_bytes < min_pallas_bytes:
        # Tiny slice: pallas_call + DMA setup overhead dominates; let XLA slice
        # (which can fuse into the consumer with zero extra HBM traffic).
        return x[0]

    rows = out_shape[0]
    n_chunks = max(1, min(_MAX_DMA_CHUNKS, rows))
    base, rem = divmod(rows, n_chunks)
    chunk_bounds = []
    start = 0
    for i in range(n_chunks):
        size = base + (1 if i < rem else 0)
        chunk_bounds.append((start, size))
        start += size
    chunk_bounds = tuple(chunk_bounds)

    kernel = _make_get_first_kernel(chunk_bounds)
    return pl.pallas_call(
        kernel,
        out_shape=jax.ShapeDtypeStruct(out_shape, x.dtype),
        in_specs=[pl.BlockSpec(memory_space=pl.ANY)],
        out_specs=pl.BlockSpec(memory_space=pl.ANY),
        scratch_shapes=[pltpu.SemaphoreType.DMA((n_chunks,))],
        # No has_side_effects: the returned data already pins ordering.
    )(x)


if __name__ == "__main__":
    key = jax.random.PRNGKey(0)
    k1, k2 = jax.random.split(key)

    # Case 1: tiny shape consistent with the module -> small-slice bypass path.
    x_small = jax.random.normal(k1, (2, 8, 128), dtype=jnp.float32)
    y_small = get_first(x_small)
    jax.block_until_ready(y_small)
    ref_small = x_small[0]
    assert y_small.shape == ref_small.shape, (y_small.shape, ref_small.shape)
    assert y_small.dtype == ref_small.dtype, (y_small.dtype, ref_small.dtype)
    assert jnp.array_equal(y_small, ref_small), "bypass path does not match x[0]"

    # Case 2: modest shape (x[0] = 512 KiB) -> Pallas chunked-parallel-DMA path.
    x_big = jax.random.normal(k2, (2, 256, 512), dtype=jnp.float32)
    y_big = get_first(x_big)
    jax.block_until_ready(y_big)
    ref_big = x_big[0]
    assert y_big.shape == ref_big.shape, (y_big.shape, ref_big.shape)
    assert y_big.dtype == ref_big.dtype, (y_big.dtype, ref_big.dtype)
    assert jnp.array_equal(y_big, ref_big), "Pallas output does not match x[0]"

    print("KERNEL_OK")
</pallas_src>

<mosaic_0001>
module attributes {stable_mosaic.version = 11 : i64} {
  func.func @kernel(%arg0: memref<2x256x512xf32, #tpu.memory_space<any>>, %arg1: memref<256x512xf32, #tpu.memory_space<any>>, %arg2: memref<8x!tpu.dma_semaphore, #tpu.memory_space<semaphore_mem>>) attributes {dimension_semantics = [], scalar_prefetch = 0 : i64, scratch_operands = 1 : i64, tpu.core_type = #tpu.core_type<tc>} {
    %c0_i32 = arith.constant 0 : i32
    %c0_i32_0 = arith.constant 0 : i32
    %c0_i32_1 = arith.constant 0 : i32
    %c0_i32_2 = arith.constant 0 : i32
    %0 = tpu.memref_slice %arg0[%c0_i32, %c0_i32_1, %c0_i32_2] : memref<2x256x512xf32, #tpu.memory_space<any>> -> memref<1x32x512xf32, #tpu.memory_space<any>>
    %1 = tpu.memref_squeeze %0 : memref<1x32x512xf32, #tpu.memory_space<any>> -> memref<32x512xf32, #tpu.memory_space<any>>
    %c0_i32_3 = arith.constant 0 : i32
    %c0_i32_4 = arith.constant 0 : i32
    %2 = tpu.memref_slice %arg1[%c0_i32_3, %c0_i32_4] : memref<256x512xf32, #tpu.memory_space<any>> -> memref<32x512xf32, #tpu.memory_space<any>>
    %3 = tpu.memref_slice %arg2[%c0_i32_0] : memref<8x!tpu.dma_semaphore, #tpu.memory_space<semaphore_mem>> -> memref<1x!tpu.dma_semaphore, #tpu.memory_space<semaphore_mem>>
    %4 = tpu.memref_squeeze %3 : memref<1x!tpu.dma_semaphore, #tpu.memory_space<semaphore_mem>> -> memref<!tpu.dma_semaphore, #tpu.memory_space<semaphore_mem>>
    tpu.enqueue_dma source(%1 : memref<32x512xf32, #tpu.memory_space<any>>) target(%2 : memref<32x512xf32, #tpu.memory_space<any>>) target_semaphore(%4 : memref<!tpu.dma_semaphore, #tpu.memory_space<semaphore_mem>>)
    %c0_i32_5 = arith.constant 0 : i32
    %c1_i32 = arith.constant 1 : i32
    %c32_i32 = arith.constant 32 : i32
    %c0_i32_6 = arith.constant 0 : i32
    %5 = tpu.memref_slice %arg0[%c0_i32_5, %c32_i32, %c0_i32_6] : memref<2x256x512xf32, #tpu.memory_space<any>> -> memref<1x32x512xf32, #tpu.memory_space<any>>
    %6 = tpu.memref_squeeze %5 : memref<1x32x512xf32, #tpu.memory_space<any>> -> memref<32x512xf32, #tpu.memory_space<any>>
    %c32_i32_7 = arith.constant 32 : i32
    %c0_i32_8 = arith.constant 0 : i32
    %7 = tpu.memref_slice %arg1[%c32_i32_7, %c0_i32_8] : memref<256x512xf32, #tpu.memory_space<any>> -> memref<32x512xf32, #tpu.memory_space<any>>
    %8 = tpu.memref_slice %arg2[%c1_i32] : memref<8x!tpu.dma_semaphore, #tpu.memory_space<semaphore_mem>> -> memref<1x!tpu.dma_semaphore, #tpu.memory_space<semaphore_mem>>
    %9 = tpu.memref_squeeze %8 : memref<1x!tpu.dma_semaphore, #tpu.memory_space<semaphore_mem>> -> memref<!tpu.dma_semaphore, #tpu.memory_space<semaphore_mem>>
    tpu.enqueue_dma source(%6 : memref<32x512xf32, #tpu.memory_space<any>>) target(%7 : memref<32x512xf32, #tpu.memory_space<any>>) target_semaphore(%9 : memref<!tpu.dma_semaphore, #tpu.memory_space<semaphore_mem>>)
    %c0_i32_9 = arith.constant 0 : i32
    %c2_i32 = arith.constant 2 : i32
    %c64_i32 = arith.constant 64 : i32
    %c0_i32_10 = arith.constant 0 : i32
    %10 = tpu.memref_slice %arg0[%c0_i32_9, %c64_i32, %c0_i32_10] : memref<2x256x512xf32, #tpu.memory_space<any>> -> memref<1x32x512xf32, #tpu.memory_space<any>>
    %11 = tpu.memref_squeeze %10 : memref<1x32x512xf32, #tpu.memory_space<any>> -> memref<32x512xf32, #tpu.memory_space<any>>
    %c64_i32_11 = arith.constant 64 : i32
    %c0_i32_12 = arith.constant 0 : i32
    %12 = tpu.memref_slice %arg1[%c64_i32_11, %c0_i32_12] : memref<256x512xf32, #tpu.memory_space<any>> -> memref<32x512xf32, #tpu.memory_space<any>>
    %13 = tpu.memref_slice %arg2[%c2_i32] : memref<8x!tpu.dma_semaphore, #tpu.memory_space<semaphore_mem>> -> memref<1x!tpu.dma_semaphore, #tpu.memory_space<semaphore_mem>>
    %14 = tpu.memref_squeeze %13 : memref<1x!tpu.dma_semaphore, #tpu.memory_space<semaphore_mem>> -> memref<!tpu.dma_semaphore, #tpu.memory_space<semaphore_mem>>
    tpu.enqueue_dma source(%11 : memref<32x512xf32, #tpu.memory_space<any>>) target(%12 : memref<32x512xf32, #tpu.memory_space<any>>) target_semaphore(%14 : memref<!tpu.dma_semaphore, #tpu.memory_space<semaphore_mem>>)
    %c0_i32_13 = arith.constant 0 : i32
    %c3_i32 = arith.constant 3 : i32
    %c96_i32 = arith.constant 96 : i32
    %c0_i32_14 = arith.constant 0 : i32
    %15 = tpu.memref_slice %arg0[%c0_i32_13, %c96_i32, %c0_i32_14] : memref<2x256x512xf32, #tpu.memory_space<any>> -> memref<1x32x512xf32, #tpu.memory_space<any>>
    %16 = tpu.memref_squeeze %15 : memref<1x32x512xf32, #tpu.memory_space<any>> -> memref<32x512xf32, #tpu.memory_space<any>>
    %c96_i32_15 = arith.constant 96 : i32
    %c0_i32_16 = arith.constant 0 : i32
    %17 = tpu.memref_slice %arg1[%c96_i32_15, %c0_i32_16] : memref<256x512xf32, #tpu.memory_space<any>> -> memref<32x512xf32, #tpu.memory_space<any>>
    %18 = tpu.memref_slice %arg2[%c3_i32] : memref<8x!tpu.dma_semaphore, #tpu.memory_space<semaphore_mem>> -> memref<1x!tpu.dma_semaphore, #tpu.memory_space<semaphore_mem>>
    %19 = tpu.memref_squeeze %18 : memref<1x!tpu.dma_semaphore, #tpu.memory_space<semaphore_mem>> -> memref<!tpu.dma_semaphore, #tpu.memory_space<semaphore_mem>>
    tpu.enqueue_dma source(%16 : memref<32x512xf32, #tpu.memory_space<any>>) target(%17 : memref<32x512xf32, #tpu.memory_space<any>>) target_semaphore(%19 : memref<!tpu.dma_semaphore, #tpu.memory_space<semaphore_mem>>)
    %c0_i32_17 = arith.constant 0 : i32
    %c4_i32 = arith.constant 4 : i32
    %c128_i32 = arith.constant 128 : i32
    %c0_i32_18 = arith.constant 0 : i32
    %20 = tpu.memref_slice %arg0[%c0_i32_17, %c128_i32, %c0_i32_18] : memref<2x256x512xf32, #tpu.memory_space<any>> -> memref<1x32x512xf32, #tpu.memory_space<any>>
    %21 = tpu.memref_squeeze %20 : memref<1x32x512xf32, #tpu.memory_space<any>> -> memref<32x512xf32, #tpu.memory_space<any>>
    %c128_i32_19 = arith.constant 128 : i32
    %c0_i32_20 = arith.constant 0 : i32
    %22 = tpu.memref_slice %arg1[%c128_i32_19, %c0_i32_20] : memref<256x512xf32, #tpu.memory_space<any>> -> memref<32x512xf32, #tpu.memory_space<any>>
    %23 = tpu.memref_slice %arg2[%c4_i32] : memref<8x!tpu.dma_semaphore, #tpu.memory_space<semaphore_mem>> -> memref<1x!tpu.dma_semaphore, #tpu.memory_space<semaphore_mem>>
    %24 = tpu.memref_squeeze %23 : memref<1x!tpu.dma_semaphore, #tpu.memory_space<semaphore_mem>> -> memref<!tpu.dma_semaphore, #tpu.memory_space<semaphore_mem>>
    tpu.enqueue_dma source(%21 : memref<32x512xf32, #tpu.memory_space<any>>) target(%22 : memref<32x512xf32, #tpu.memory_space<any>>) target_semaphore(%24 : memref<!tpu.dma_semaphore, #tpu.memory_space<semaphore_mem>>)
    %c0_i32_21 = arith.constant 0 : i32
    %c5_i32 = arith.constant 5 : i32
    %c160_i32 = arith.constant 160 : i32
    %c0_i32_22 = arith.constant 0 : i32
    %25 = tpu.memref_slice %arg0[%c0_i32_21, %c160_i32, %c0_i32_22] : memref<2x256x512xf32, #tpu.memory_space<any>> -> memref<1x32x512xf32, #tpu.memory_space<any>>
    %26 = tpu.memref_squeeze %25 : memref<1x32x512xf32, #tpu.memory_space<any>> -> memref<32x512xf32, #tpu.memory_space<any>>
    %c160_i32_23 = arith.constant 160 : i32
    %c0_i32_24 = arith.constant 0 : i32
    %27 = tpu.memref_slice %arg1[%c160_i32_23, %c0_i32_24] : memref<256x512xf32, #tpu.memory_space<any>> -> memref<32x512xf32, #tpu.memory_space<any>>
    %28 = tpu.memref_slice %arg2[%c5_i32] : memref<8x!tpu.dma_semaphore, #tpu.memory_space<semaphore_mem>> -> memref<1x!tpu.dma_semaphore, #tpu.memory_space<semaphore_mem>>
    %29 = tpu.memref_squeeze %28 : memref<1x!tpu.dma_semaphore, #tpu.memory_space<semaphore_mem>> -> memref<!tpu.dma_semaphore, #tpu.memory_space<semaphore_mem>>
    tpu.enqueue_dma source(%26 : memref<32x512xf32, #tpu.memory_space<any>>) target(%27 : memref<32x512xf32, #tpu.memory_space<any>>) target_semaphore(%29 : memref<!tpu.dma_semaphore, #tpu.memory_space<semaphore_mem>>)
    %c0_i32_25 = arith.constant 0 : i32
    %c6_i32 = arith.constant 6 : i32
    %c192_i32 = arith.constant 192 : i32
    %c0_i32_26 = arith.constant 0 : i32
    %30 = tpu.memref_slice %arg0[%c0_i32_25, %c192_i32, %c0_i32_26] : memref<2x256x512xf32, #tpu.memory_space<any>> -> memref<1x32x512xf32, #tpu.memory_space<any>>
    %31 = tpu.memref_squeeze %30 : memref<1x32x512xf32, #tpu.memory_space<any>> -> memref<32x512xf32, #tpu.memory_space<any>>
    %c192_i32_27 = arith.constant 192 : i32
    %c0_i32_28 = arith.constant 0 : i32
    %32 = tpu.memref_slice %arg1[%c192_i32_27, %c0_i32_28] : memref<256x512xf32, #tpu.memory_space<any>> -> memref<32x512xf32, #tpu.memory_space<any>>
    %33 = tpu.memref_slice %arg2[%c6_i32] : memref<8x!tpu.dma_semaphore, #tpu.memory_space<semaphore_mem>> -> memref<1x!tpu.dma_semaphore, #tpu.memory_space<semaphore_mem>>
    %34 = tpu.memref_squeeze %33 : memref<1x!tpu.dma_semaphore, #tpu.memory_space<semaphore_mem>> -> memref<!tpu.dma_semaphore, #tpu.memory_space<semaphore_mem>>
    tpu.enqueue_dma source(%31 : memref<32x512xf32, #tpu.memory_space<any>>) target(%32 : memref<32x512xf32, #tpu.memory_space<any>>) target_semaphore(%34 : memref<!tpu.dma_semaphore, #tpu.memory_space<semaphore_mem>>)
    %c0_i32_29 = arith.constant 0 : i32
    %c7_i32 = arith.constant 7 : i32
    %c224_i32 = arith.constant 224 : i32
    %c0_i32_30 = arith.constant 0 : i32
    %35 = tpu.memref_slice %arg0[%c0_i32_29, %c224_i32, %c0_i32_30] : memref<2x256x512xf32, #tpu.memory_space<any>> -> memref<1x32x512xf32, #tpu.memory_space<any>>
    %36 = tpu.memref_squeeze %35 : memref<1x32x512xf32, #tpu.memory_space<any>> -> memref<32x512xf32, #tpu.memory_space<any>>
    %c224_i32_31 = arith.constant 224 : i32
    %c0_i32_32 = arith.constant 0 : i32
    %37 = tpu.memref_slice %arg1[%c224_i32_31, %c0_i32_32] : memref<256x512xf32, #tpu.memory_space<any>> -> memref<32x512xf32, #tpu.memory_space<any>>
    %38 = tpu.memref_slice %arg2[%c7_i32] : memref<8x!tpu.dma_semaphore, #tpu.memory_space<semaphore_mem>> -> memref<1x!tpu.dma_semaphore, #tpu.memory_space<semaphore_mem>>
    %39 = tpu.memref_squeeze %38 : memref<1x!tpu.dma_semaphore, #tpu.memory_space<semaphore_mem>> -> memref<!tpu.dma_semaphore, #tpu.memory_space<semaphore_mem>>
    tpu.enqueue_dma source(%36 : memref<32x512xf32, #tpu.memory_space<any>>) target(%37 : memref<32x512xf32, #tpu.memory_space<any>>) target_semaphore(%39 : memref<!tpu.dma_semaphore, #tpu.memory_space<semaphore_mem>>)
    %c0_i32_33 = arith.constant 0 : i32
    %c0_i32_34 = arith.constant 0 : i32
    %c0_i32_35 = arith.constant 0 : i32
    %c0_i32_36 = arith.constant 0 : i32
    %40 = tpu.memref_slice %arg0[%c0_i32_33, %c0_i32_35, %c0_i32_36] : memref<2x256x512xf32, #tpu.memory_space<any>> -> memref<1x32x512xf32, #tpu.memory_space<any>>
    %41 = tpu.memref_squeeze %40 : memref<1x32x512xf32, #tpu.memory_space<any>> -> memref<32x512xf32, #tpu.memory_space<any>>
    %c0_i32_37 = arith.constant 0 : i32
    %c0_i32_38 = arith.constant 0 : i32
    %42 = tpu.memref_slice %arg1[%c0_i32_37, %c0_i32_38] : memref<256x512xf32, #tpu.memory_space<any>> -> memref<32x512xf32, #tpu.memory_space<any>>
    %43 = tpu.memref_slice %arg2[%c0_i32_34] : memref<8x!tpu.dma_semaphore, #tpu.memory_space<semaphore_mem>> -> memref<1x!tpu.dma_semaphore, #tpu.memory_space<semaphore_mem>>
    %44 = tpu.memref_squeeze %43 : memref<1x!tpu.dma_semaphore, #tpu.memory_space<semaphore_mem>> -> memref<!tpu.dma_semaphore, #tpu.memory_space<semaphore_mem>>
    tpu.wait_dma2 semaphore(%44 : memref<!tpu.dma_semaphore, #tpu.memory_space<semaphore_mem>>) src(%41 : memref<32x512xf32, #tpu.memory_space<any>>) dst(%42 : memref<32x512xf32, #tpu.memory_space<any>>)
    %c0_i32_39 = arith.constant 0 : i32
    %c1_i32_40 = arith.constant 1 : i32
    %c32_i32_41 = arith.constant 32 : i32
    %c0_i32_42 = arith.constant 0 : i32
    %45 = tpu.memref_slice %arg0[%c0_i32_39, %c32_i32_41, %c0_i32_42] : memref<2x256x512xf32, #tpu.memory_space<any>> -> memref<1x32x512xf32, #tpu.memory_space<any>>
    %46 = tpu.memref_squeeze %45 : memref<1x32x512xf32, #tpu.memory_space<any>> -> memref<32x512xf32, #tpu.memory_space<any>>
    %c32_i32_43 = arith.constant 32 : i32
    %c0_i32_44 = arith.constant 0 : i32
    %47 = tpu.memref_slice %arg1[%c32_i32_43, %c0_i32_44] : memref<256x512xf32, #tpu.memory_space<any>> -> memref<32x512xf32, #tpu.memory_space<any>>
    %48 = tpu.memref_slice %arg2[%c1_i32_40] : memref<8x!tpu.dma_semaphore, #tpu.memory_space<semaphore_mem>> -> memref<1x!tpu.dma_semaphore, #tpu.memory_space<semaphore_mem>>
    %49 = tpu.memref_squeeze %48 : memref<1x!tpu.dma_semaphore, #tpu.memory_space<semaphore_mem>> -> memref<!tpu.dma_semaphore, #tpu.memory_space<semaphore_mem>>
    tpu.wait_dma2 semaphore(%49 : memref<!tpu.dma_semaphore, #tpu.memory_space<semaphore_mem>>) src(%46 : memref<32x512xf32, #tpu.memory_space<any>>) dst(%47 : memref<32x512xf32, #tpu.memory_space<any>>)
    %c0_i32_45 = arith.constant 0 : i32
    %c2_i32_46 = arith.constant 2 : i32
    %c64_i32_47 = arith.constant 64 : i32
    %c0_i32_48 = arith.constant 0 : i32
    %50 = tpu.memref_slice %arg0[%c0_i32_45, %c64_i32_47, %c0_i32_48] : memref<2x256x512xf32, #tpu.memory_space<any>> -> memref<1x32x512xf32, #tpu.memory_space<any>>
    %51 = tpu.memref_squeeze %50 : memref<1x32x512xf32, #tpu.memory_space<any>> -> memref<32x512xf32, #tpu.memory_space<any>>
    %c64_i32_49 = arith.constant 64 : i32
    %c0_i32_50 = arith.constant 0 : i32
    %52 = tpu.memref_slice %arg1[%c64_i32_49, %c0_i32_50] : memref<256x512xf32, #tpu.memory_space<any>> -> memref<32x512xf32, #tpu.memory_space<any>>
    %53 = tpu.memref_slice %arg2[%c2_i32_46] : memref<8x!tpu.dma_semaphore, #tpu.memory_space<semaphore_mem>> -> memref<1x!tpu.dma_semaphore, #tpu.memory_space<semaphore_mem>>
    %54 = tpu.memref_squeeze %53 : memref<1x!tpu.dma_semaphore, #tpu.memory_space<semaphore_mem>> -> memref<!tpu.dma_semaphore, #tpu.memory_space<semaphore_mem>>
    tpu.wait_dma2 semaphore(%54 : memref<!tpu.dma_semaphore, #tpu.memory_space<semaphore_mem>>) src(%51 : memref<32x512xf32, #tpu.memory_space<any>>) dst(%52 : memref<32x512xf32, #tpu.memory_space<any>>)
    %c0_i32_51 = arith.constant 0 : i32
    %c3_i32_52 = arith.constant 3 : i32
    %c96_i32_53 = arith.constant 96 : i32
    %c0_i32_54 = arith.constant 0 : i32
    %55 = tpu.memref_slice %arg0[%c0_i32_51, %c96_i32_53, %c0_i32_54] : memref<2x256x512xf32, #tpu.memory_space<any>> -> memref<1x32x512xf32, #tpu.memory_space<any>>
    %56 = tpu.memref_squeeze %55 : memref<1x32x512xf32, #tpu.memory_space<any>> -> memref<32x512xf32, #tpu.memory_space<any>>
    %c96_i32_55 = arith.constant 96 : i32
    %c0_i32_56 = arith.constant 0 : i32
    %57 = tpu.memref_slice %arg1[%c96_i32_55, %c0_i32_56] : memref<256x512xf32, #tpu.memory_space<any>> -> memref<32x512xf32, #tpu.memory_space<any>>
    %58 = tpu.memref_slice %arg2[%c3_i32_52] : memref<8x!tpu.dma_semaphore, #tpu.memory_space<semaphore_mem>> -> memref<1x!tpu.dma_semaphore, #tpu.memory_space<semaphore_mem>>
    %59 = tpu.memref_squeeze %58 : memref<1x!tpu.dma_semaphore, #tpu.memory_space<semaphore_mem>> -> memref<!tpu.dma_semaphore, #tpu.memory_space<semaphore_mem>>
    tpu.wait_dma2 semaphore(%59 : memref<!tpu.dma_semaphore, #tpu.memory_space<semaphore_mem>>) src(%56 : memref<32x512xf32, #tpu.memory_space<any>>) dst(%57 : memref<32x512xf32, #tpu.memory_space<any>>)
    %c0_i32_57 = arith.constant 0 : i32
    %c4_i32_58 = arith.constant 4 : i32
    %c128_i32_59 = arith.constant 128 : i32
    %c0_i32_60 = arith.constant 0 : i32
    %60 = tpu.memref_slice %arg0[%c0_i32_57, %c128_i32_59, %c0_i32_60] : memref<2x256x512xf32, #tpu.memory_space<any>> -> memref<1x32x512xf32, #tpu.memory_space<any>>
    %61 = tpu.memref_squeeze %60 : memref<1x32x512xf32, #tpu.memory_space<any>> -> memref<32x512xf32, #tpu.memory_space<any>>
    %c128_i32_61 = arith.constant 128 : i32
    %c0_i32_62 = arith.constant 0 : i32
    %62 = tpu.memref_slice %arg1[%c128_i32_61, %c0_i32_62] : memref<256x512xf32, #tpu.memory_space<any>> -> memref<32x512xf32, #tpu.memory_space<any>>
    %63 = tpu.memref_slice %arg2[%c4_i32_58] : memref<8x!tpu.dma_semaphore, #tpu.memory_space<semaphore_mem>> -> memref<1x!tpu.dma_semaphore, #tpu.memory_space<semaphore_mem>>
    %64 = tpu.memref_squeeze %63 : memref<1x!tpu.dma_semaphore, #tpu.memory_space<semaphore_mem>> -> memref<!tpu.dma_semaphore, #tpu.memory_space<semaphore_mem>>
    tpu.wait_dma2 semaphore(%64 : memref<!tpu.dma_semaphore, #tpu.memory_space<semaphore_mem>>) src(%61 : memref<32x512xf32, #tpu.memory_space<any>>) dst(%62 : memref<32x512xf32, #tpu.memory_space<any>>)
    %c0_i32_63 = arith.constant 0 : i32
    %c5_i32_64 = arith.constant 5 : i32
    %c160_i32_65 = arith.constant 160 : i32
    %c0_i32_66 = arith.constant 0 : i32
    %65 = tpu.memref_slice %arg0[%c0_i32_63, %c160_i32_65, %c0_i32_66] : memref<2x256x512xf32, #tpu.memory_space<any>> -> memref<1x32x512xf32, #tpu.memory_space<any>>
    %66 = tpu.memref_squeeze %65 : memref<1x32x512xf32, #tpu.memory_space<any>> -> memref<32x512xf32, #tpu.memory_space<any>>
    %c160_i32_67 = arith.constant 160 : i32
    %c0_i32_68 = arith.constant 0 : i32
    %67 = tpu.memref_slice %arg1[%c160_i32_67, %c0_i32_68] : memref<256x512xf32, #tpu.memory_space<any>> -> memref<32x512xf32, #tpu.memory_space<any>>
    %68 = tpu.memref_slice %arg2[%c5_i32_64] : memref<8x!tpu.dma_semaphore, #tpu.memory_space<semaphore_mem>> -> memref<1x!tpu.dma_semaphore, #tpu.memory_space<semaphore_mem>>
    %69 = tpu.memref_squeeze %68 : memref<1x!tpu.dma_semaphore, #tpu.memory_space<semaphore_mem>> -> memref<!tpu.dma_semaphore, #tpu.memory_space<semaphore_mem>>
    tpu.wait_dma2 semaphore(%69 : memref<!tpu.dma_semaphore, #tpu.memory_space<semaphore_mem>>) src(%66 : memref<32x512xf32, #tpu.memory_space<any>>) dst(%67 : memref<32x512xf32, #tpu.memory_space<any>>)
    %c0_i32_69 = arith.constant 0 : i32
    %c6_i32_70 = arith.constant 6 : i32
    %c192_i32_71 = arith.constant 192 : i32
    %c0_i32_72 = arith.constant 0 : i32
    %70 = tpu.memref_slice %arg0[%c0_i32_69, %c192_i32_71, %c0_i32_72] : memref<2x256x512xf32, #tpu.memory_space<any>> -> memref<1x32x512xf32, #tpu.memory_space<any>>
    %71 = tpu.memref_squeeze %70 : memref<1x32x512xf32, #tpu.memory_space<any>> -> memref<32x512xf32, #tpu.memory_space<any>>
    %c192_i32_73 = arith.constant 192 : i32
    %c0_i32_74 = arith.constant 0 : i32
    %72 = tpu.memref_slice %arg1[%c192_i32_73, %c0_i32_74] : memref<256x512xf32, #tpu.memory_space<any>> -> memref<32x512xf32, #tpu.memory_space<any>>
    %73 = tpu.memref_slice %arg2[%c6_i32_70] : memref<8x!tpu.dma_semaphore, #tpu.memory_space<semaphore_mem>> -> memref<1x!tpu.dma_semaphore, #tpu.memory_space<semaphore_mem>>
    %74 = tpu.memref_squeeze %73 : memref<1x!tpu.dma_semaphore, #tpu.memory_space<semaphore_mem>> -> memref<!tpu.dma_semaphore, #tpu.memory_space<semaphore_mem>>
    tpu.wait_dma2 semaphore(%74 : memref<!tpu.dma_semaphore, #tpu.memory_space<semaphore_mem>>) src(%71 : memref<32x512xf32, #tpu.memory_space<any>>) dst(%72 : memref<32x512xf32, #tpu.memory_space<any>>)
    %c0_i32_75 = arith.constant 0 : i32
    %c7_i32_76 = arith.constant 7 : i32
    %c224_i32_77 = arith.constant 224 : i32
    %c0_i32_78 = arith.constant 0 : i32
    %75 = tpu.memref_slice %arg0[%c0_i32_75, %c224_i32_77, %c0_i32_78] : memref<2x256x512xf32, #tpu.memory_space<any>> -> memref<1x32x512xf32, #tpu.memory_space<any>>
    %76 = tpu.memref_squeeze %75 : memref<1x32x512xf32, #tpu.memory_space<any>> -> memref<32x512xf32, #tpu.memory_space<any>>
    %c224_i32_79 = arith.constant 224 : i32
    %c0_i32_80 = arith.constant 0 : i32
    %77 = tpu.memref_slice %arg1[%c224_i32_79, %c0_i32_80] : memref<256x512xf32, #tpu.memory_space<any>> -> memref<32x512xf32, #tpu.memory_space<any>>
    %78 = tpu.memref_slice %arg2[%c7_i32_76] : memref<8x!tpu.dma_semaphore, #tpu.memory_space<semaphore_mem>> -> memref<1x!tpu.dma_semaphore, #tpu.memory_space<semaphore_mem>>
    %79 = tpu.memref_squeeze %78 : memref<1x!tpu.dma_semaphore, #tpu.memory_space<semaphore_mem>> -> memref<!tpu.dma_semaphore, #tpu.memory_space<semaphore_mem>>
    tpu.wait_dma2 semaphore(%79 : memref<!tpu.dma_semaphore, #tpu.memory_space<semaphore_mem>>) src(%76 : memref<32x512xf32, #tpu.memory_space<any>>) dst(%77 : memref<32x512xf32, #tpu.memory_space<any>>)
    return
  }
}

</mosaic_0001>

<bundles_post_ra>
// kernel: tpu_custom_call.1
= control target key start
LH: loop header
LB: loop body
LE: loop exit
PB: predicated region body
PF: predicated region fallthrough
CT: control target
= control target key end

     0   :  { %s229_s15 = smov [#allocation2]   ;;  %s230_s16 = smov [#allocation3]   ;;  %s312_s0 = inlined_call_operand.hbm [shape: f32[2,256,512], index: 0, kind: input, shape index: {}]   ;;  %s313_s1 = inlined_call_operand.hbm [shape: f32[256,512], index: 1, kind: output, shape index: {}]  }
   0x1   :  { %s10_s8 = sshll.u32 %s312_s0, 4  ;;  %s12_s11 = sshll.u32 %s313_s1, 4  ;;  %s11_s8 = int_to_ptr.hbm [resolvable:$true] %s10_s8  ;;  %s13_s11 = int_to_ptr.hbm [resolvable:$true] %s12_s11 }
   0x2   :  { %s17_s14 = scalar_lea.hbm %s312_s0, 128  ;;  %s231_s17 = smov 0  }
   0x3   :  { %16 = dma.general %s11_s8, 2048, %s13_s11, %s229_s15, %s230_s16, [#allocation4], %s231_s17, 0  }
   0x4   :  { %s18_s20 = scalar_lea.hbm %s313_s1, 128  ;;  %s24_s21 = sshll.u32 %s17_s14, 4  ;;  %s25_s21 = int_to_ptr.hbm [resolvable:$true] %s24_s21 }
   0x5   :  { %s26_s22 = sshll.u32 %s18_s20, 4  ;;  %s31_s25 = scalar_lea.hbm %s312_s0, 256  ;;  %s27_s22 = int_to_ptr.hbm [resolvable:$true] %s26_s22 }
   0x6   :  { %s232_s26 = smov [#allocation2 + $0x1]   ;;  %s233_s27 = smov [#allocation5]  }
   0x7   :  { %30 = dma.general %s25_s21, 2048, %s27_s22, %s232_s26, %s233_s27, [#allocation6], %s231_s17, 0  }
   0x8   :  { %s32_s30 = scalar_lea.hbm %s313_s1, 256  ;;  %s38_s2 = sshll.u32 %s31_s25, 4  ;;  %s39_s2 = int_to_ptr.hbm [resolvable:$true] %s38_s2 }
   0x9   :  { %s40_s3 = sshll.u32 %s32_s30, 4  ;;  %s45_s6 = scalar_lea.hbm %s312_s0, 384  ;;  %s41_s3 = int_to_ptr.hbm [resolvable:$true] %s40_s3 }
   0xa   :  { %s234_s7 = smov [#allocation2 + $0x2]   ;;  %s235_s8 = smov [#allocation7]  }
   0xb   :  { %44 = dma.general %s39_s2, 2048, %s41_s3, %s234_s7, %s235_s8, [#allocation8], %s231_s17, 0  }
   0xc   :  { %s46_s11 = scalar_lea.hbm %s313_s1, 384  ;;  %s52_s12 = sshll.u32 %s45_s6, 4  ;;  %s53_s12 = int_to_ptr.hbm [resolvable:$true] %s52_s12 }
   0xd   :  { %s54_s13 = sshll.u32 %s46_s11, 4  ;;  %s59_s16 = scalar_lea.hbm %s312_s0, 512  ;;  %s55_s13 = int_to_ptr.hbm [resolvable:$true] %s54_s13 }
   0xe   :  { %s236_s18 = smov [#allocation2 + $0x3]   ;;  %s237_s19 = smov [#allocation9]  }
   0xf   :  { %58 = dma.general %s53_s12, 2048, %s55_s13, %s236_s18, %s237_s19, [#allocation10], %s231_s17, 0  }
  0x10   :  { %s60_s22 = scalar_lea.hbm %s313_s1, 512  ;;  %s66_s23 = sshll.u32 %s59_s16, 4  ;;  %s67_s23 = int_to_ptr.hbm [resolvable:$true] %s66_s23 }
  0x11   :  { %s68_s24 = sshll.u32 %s60_s22, 4  ;;  %s73_s27 = scalar_lea.hbm %s312_s0, 640  ;;  %s69_s24 = int_to_ptr.hbm [resolvable:$true] %s68_s24 }
  0x12   :  { %s238_s28 = smov [#allocation2 + $0x4]   ;;  %s239_s29 = smov [#allocation11]  }
  0x13   :  { %72 = dma.general %s67_s23, 2048, %s69_s24, %s238_s28, %s239_s29, [#allocation12], %s231_s17, 0  }
  0x14   :  { %s74_s3 = scalar_lea.hbm %s313_s1, 640  ;;  %s80_s4 = sshll.u32 %s73_s27, 4  ;;  %s81_s4 = int_to_ptr.hbm [resolvable:$true] %s80_s4 }
  0x15   :  { %s82_s5 = sshll.u32 %s74_s3, 4  ;;  %s87_s8 = scalar_lea.hbm %s312_s0, 768  ;;  %s83_s5 = int_to_ptr.hbm [resolvable:$true] %s82_s5 }
  0x16   :  { %s240_s9 = smov [#allocation2 + $0x5]   ;;  %s241_s10 = smov [#allocation13]  }
  0x17   :  { %86 = dma.general %s81_s4, 2048, %s83_s5, %s240_s9, %s241_s10, [#allocation14], %s231_s17, 0  }
  0x18   :  { %s88_s13 = scalar_lea.hbm %s313_s1, 768  ;;  %s94_s14 = sshll.u32 %s87_s8, 4  ;;  %s95_s14 = int_to_ptr.hbm [resolvable:$true] %s94_s14 }
  0x19   :  { %s96_s15 = sshll.u32 %s88_s13, 4  ;;  %s101_s19 = scalar_lea.hbm %s312_s0, 896  ;;  %s97_s15 = int_to_ptr.hbm [resolvable:$true] %s96_s15 }
  0x1a   :  { %s242_s20 = smov [#allocation2 + $0x6]   ;;  %s243_s21 = smov [#allocation15]  }
  0x1b   :  { %100 = dma.general %s95_s14, 2048, %s97_s15, %s242_s20, %s243_s21, [#allocation16], %s231_s17, 0  }
  0x1c   :  { %s102_s24 = scalar_lea.hbm %s313_s1, 896  ;;  %s108_s25 = sshll.u32 %s101_s19, 4  ;;  %s109_s25 = int_to_ptr.hbm [resolvable:$true] %s108_s25 }
  0x1d   :  { %s110_s26 = sshll.u32 %s102_s24, 4  ;;  %s244_s27 = smov [#allocation2 + $0x7]   ;;  %s111_s26 = int_to_ptr.hbm [resolvable:$true] %s110_s26 }
  0x1e   :  { %s245_s28 = smov [#allocation17]  }
  0x1f   :  { %114 = dma.general %s109_s25, 2048, %s111_s26, %s244_s27, %s245_s28, [#allocation18], %s231_s17, 0  }
  0x20   :  { %213 = dma.done.wait [#allocation2], 2048 }
  0x21   :  { %214 = vsyncadd [#allocation2], 4294965248 }
  0x22   :  { %215 = dma.done.wait [#allocation2 + $0x1], 2048 }
  0x23   :  { %216 = vsyncadd [#allocation2 + $0x1], 4294965248 }
  0x24   :  { %217 = dma.done.wait [#allocation2 + $0x2], 2048 }
  0x25   :  { %218 = vsyncadd [#allocation2 + $0x2], 4294965248 }
  0x26   :  { %219 = dma.done.wait [#allocation2 + $0x3], 2048 }
  0x27   :  { %220 = vsyncadd [#allocation2 + $0x3], 4294965248 }
  0x28   :  { %221 = dma.done.wait [#allocation2 + $0x4], 2048 }
  0x29   :  { %222 = vsyncadd [#allocation2 + $0x4], 4294965248 }
  0x2a   :  { %223 = dma.done.wait [#allocation2 + $0x5], 2048 }
  0x2b   :  { %224 = vsyncadd [#allocation2 + $0x5], 4294965248 }
  0x2c   :  { %225 = dma.done.wait [#allocation2 + $0x6], 2048 }
  0x2d   :  { %226 = vsyncadd [#allocation2 + $0x6], 4294965248 }
  0x2e   :  { %227 = dma.done.wait [#allocation2 + $0x7], 2048 }
  0x2f   :  { %228 = vsyncadd [#allocation2 + $0x7], 4294965248 }
  0x30   :  { %133 = vsyncmov [#allocation2] }
  0x33   :  { %s134_s0 = vpop.sfrf %133 }
  0x34   :  { %p188_p0 = scmp.ne.s32.totalorder %s134_s0, 0 }
  0x36   :  { %138 = shalt.err (%p188_p0)  }
  0x37   :  { %140 = vsyncmov [#allocation2 + $0x1] }
  0x3a   :  { %s141_s1 = vpop.sfrf %140 }
  0x3b   :  { %p189_p1 = scmp.ne.s32.totalorder %s141_s1, 0 }
  0x3d   :  { %145 = shalt.err (%p189_p1)  }
  0x3e   :  { %147 = vsyncmov [#allocation2 + $0x2] }
  0x41   :  { %s148_s17 = vpop.sfrf %147 }
  0x42   :  { %p190_p2 = scmp.ne.s32.totalorder %s148_s17, 0 }
  0x44   :  { %152 = shalt.err (%p190_p2)  }
  0x45   :  { %154 = vsyncmov [#allocation2 + $0x3] }
  0x48   :  { %s155_s29 = vpop.sfrf %154 }
  0x49   :  { %p191_p3 = scmp.ne.s32.totalorder %s155_s29, 0 }
  0x4b   :  { %159 = shalt.err (%p191_p3)  }
  0x4c   :  { %161 = vsyncmov [#allocation2 + $0x4] }
  0x4f   :  { %s162_s30 = vpop.sfrf %161 }
  0x50   :  { %p192_p4 = scmp.ne.s32.totalorder %s162_s30, 0 }
  0x52   :  { %166 = shalt.err (%p192_p4)  }
  0x53   :  { %168 = vsyncmov [#allocation2 + $0x5] }
  0x56   :  { %s169_s2 = vpop.sfrf %168 }
  0x57   :  { %p193_p5 = scmp.ne.s32.totalorder %s169_s2, 0 }
  0x59   :  { %173 = shalt.err (%p193_p5)  }
  0x5a   :  { %175 = vsyncmov [#allocation2 + $0x6] }
  0x5d   :  { %s176_s3 = vpop.sfrf %175 }
  0x5e   :  { %p194_p6 = scmp.ne.s32.totalorder %s176_s3, 0 }
  0x60   :  { %180 = shalt.err (%p194_p6)  }
  0x61   :  { %182 = vsyncmov [#allocation2 + $0x7] }
  0x64   :  { %s183_s4 = vpop.sfrf %182 }
  0x65   :  { %p195_p7 = scmp.ne.s32.totalorder %s183_s4, 0 }
  0x67   :  { %187 = shalt.err (%p195_p7)  }

</bundles_post_ra>
